<compile_context>
chip_gen: v7x
topology: tpu7x:2x2x1
jax: 0.10.0
libtpu: 0.0.40
codegen_flags: <defaults>
</compile_context>

<pallas_src>
import functools
import math

import jax
import jax.numpy as jnp
from jax.experimental import pallas as pl
from jax.experimental.pallas import tpu as pltpu


# ----------------------------- constants -------------------------------------
SAMPLE_RATE = 16000
NORM_DB = -3.0
FFT_WINDOW_MS = 25.0
FFT_HOP_MS = 10.0
F_MIN = 50.0
N_MELS = 40

N_FFT = int(SAMPLE_RATE * FFT_WINDOW_MS / 1000)     # 400
HOP = int(SAMPLE_RATE * FFT_HOP_MS / 1000)          # 160
N_FREQ = N_FFT // 2 + 1                             # 201

# TPU-friendly padded tile sizes (lane/sublane aligned)
MAX_TILE_T = 256                                    # max frames per grid step
FP = 512                                            # n_fft 400 -> 512
NFP = 256                                           # n_freq 201 -> 256 (lane-aligned split)
NMP = 128                                           # n_mels 40 -> 128 (lane-dense stores)


def _round_up(x, m):
    return ((x + m - 1) // m) * m


# --------------------------- constant matrices --------------------------------
def _mel_filterbank(n_freq, f_min, f_max, n_mels, sample_rate):
    # torchaudio.functional.melscale_fbanks, mel_scale="htk", norm=None
    def hz_to_mel(f):
        return 2595.0 * jnp.log10(1.0 + f / 700.0)

    def mel_to_hz(m):
        return 700.0 * (10.0 ** (m / 2595.0) - 1.0)

    all_freqs = jnp.linspace(0.0, sample_rate / 2.0, n_freq)
    m_min = hz_to_mel(jnp.asarray(f_min))
    m_max = hz_to_mel(jnp.asarray(f_max))
    m_pts = jnp.linspace(m_min, m_max, n_mels + 2)
    f_pts = mel_to_hz(m_pts)                                   # (n_mels+2,)
    f_diff = f_pts[1:] - f_pts[:-1]                            # (n_mels+1,)
    slopes = f_pts[None, :] - all_freqs[:, None]               # (n_freq, n_mels+2)
    down = -slopes[:, :-2] / f_diff[:-1]
    up = slopes[:, 2:] / f_diff[1:]
    fb = jnp.maximum(0.0, jnp.minimum(down, up))               # (n_freq, n_mels)
    return fb.astype(jnp.float32)


@functools.lru_cache(maxsize=None)
def _logmel_constants():
    """Window-folded cos|sin DFT matrix (bf16) + padded mel filterbank (f32)."""
    # Hann window (periodic), folded directly into the DFT matrices.
    i = jnp.arange(N_FFT, dtype=jnp.float32)
    window = 0.5 * (1.0 - jnp.cos(2.0 * math.pi * i / N_FFT))

    # One-sided DFT. Keep the trig argument in [0, 2*pi): n*k < 2^24 so the
    # f32 product and mod are exact (avoids large-argument trig error).
    n = jnp.arange(N_FFT, dtype=jnp.float32)[:, None]
    k = jnp.arange(N_FREQ, dtype=jnp.float32)[None, :]
    ang = 2.0 * math.pi * jnp.mod(n * k, float(N_FFT)) / N_FFT
    # NOTE: the DFT imaginary part is -sin; the sign is irrelevant here since
    # only |X|^2 is consumed, but keep the proper convention for future use.
    wcos = jnp.cos(ang) * window[:, None]                      # (N_FFT, N_FREQ)
    wsin = -jnp.sin(ang) * window[:, None]

    trig = jnp.zeros((FP, 2 * NFP), jnp.float32)
    trig = trig.at[:N_FFT, :N_FREQ].set(wcos)
    trig = trig.at[:N_FFT, NFP:NFP + N_FREQ].set(wsin)
    trig = trig.astype(jnp.bfloat16)                           # MXU-native operands

    fb = _mel_filterbank(N_FREQ, F_MIN, SAMPLE_RATE / 2.0, N_MELS, SAMPLE_RATE)
    fb_p = jnp.zeros((NFP, NMP), jnp.float32).at[:N_FREQ, :N_MELS].set(fb)
    return trig, fb_p


# ------------------------------- Pallas kernel --------------------------------
def logmel_kernel(frames_ref, trig_ref, fb_ref, out_ref):
    nfp = trig_ref.shape[1] // 2
    # Fused real|imag DFT: one MXU pass over the LHS tile (bf16 in, f32 acc).
    y = jnp.dot(frames_ref[...], trig_ref[...],
                preferred_element_type=jnp.float32)            # (tile_t, 2*NFP) f32
    sq = y * y
    power = sq[:, :nfp] + sq[:, nfp:]                          # |X|^2 (power=2.0), f32
    # Small mel-filterbank matmul kept in f32 for accuracy before the log.
    mel = jnp.dot(power, fb_ref[...], preferred_element_type=jnp.float32)
    out_ref[...] = jnp.log(jnp.maximum(mel, 1e-9))             # log(clamp(min=1e-9))


def logmel_pallas(frames):
    """frames: (num_frames, n_fft) f32 -> (num_frames, n_mels) f32 log-mel."""
    T = frames.shape[0]
    # Adaptive tile: short clips only pay for round_up(T, 8) frames of MXU work.
    tile_t = min(MAX_TILE_T, _round_up(T, 8))
    Tp = _round_up(T, tile_t)
    # Single fused pad (XLA fuses this with the framing concat) + bf16 cast for MXU.
    frames_p = jnp.pad(frames, ((0, Tp - T), (0, FP - N_FFT))).astype(jnp.bfloat16)
    trig, fb = _logmel_constants()

    out = pl.pallas_call(
        logmel_kernel,
        out_shape=jax.ShapeDtypeStruct((Tp, NMP), jnp.float32),
        grid=(Tp // tile_t,),
        in_specs=[
            # frames stream block-by-block; constants stay VMEM-resident
            # (invariant index_map -> fetched once).
            pl.BlockSpec((tile_t, FP), lambda i: (i, 0)),
            pl.BlockSpec((FP, 2 * NFP), lambda i: (0, 0)),
            pl.BlockSpec((NFP, NMP), lambda i: (0, 0)),
        ],
        out_specs=pl.BlockSpec((tile_t, NMP), lambda i: (i, 0)),
        compiler_params=pltpu.CompilerParams(
            dimension_semantics=("parallel",)),                # megacore / v7x cores
    )(frames_p, trig, fb)

    return out[:T, :N_MELS]                                    # (num_frames, n_mels)


# ------------------------------- framing helper --------------------------------
def _frame_signal(padded, num_frames):
    """(L,) reflect-padded signal -> (num_frames, N_FFT) frames, hop=HOP.

    Uses a hop-row decomposition (reshape + shifted row slices + concat) instead
    of a full integer gather: frame i = rows [i, i+1] of the hop grid plus the
    first (N_FFT - 2*HOP) samples of row i+2.
    """
    n_full = N_FFT // HOP                                      # 2
    rem = N_FFT - n_full * HOP                                 # 80
    rows = num_frames + n_full - 1 + (1 if rem else 0)
    total = rows * HOP
    L = padded.shape[0]
    if total >= L:
        padded = jnp.pad(padded, (0, total - L))
    else:
        padded = padded[:total]
    w = padded.reshape(rows, HOP)
    parts = [w[j:j + num_frames] for j in range(n_full)]
    if rem:
        parts.append(w[n_full:n_full + num_frames, :rem])
    return jnp.concatenate(parts, axis=1)                      # (num_frames, N_FFT)


# ------------------------------- Wav2Mel wrapper -------------------------------
@functools.partial(jax.jit, static_argnums=(1,))
def wav2mel(wav, sample_rate):
    """wav: (channels, samples) float32. Returns (num_frames, n_mels)."""
    assert sample_rate == SAMPLE_RATE
    # TODO(synk): sox `rate` resampling not implemented; input assumed at 16 kHz.

    # SoxEffects: ['channels','1'] -> mixdown; ['norm','-3'] -> peak normalize to -3 dBFS
    mono = jnp.mean(wav.astype(jnp.float32), axis=0)           # (samples,)
    peak = jnp.max(jnp.abs(mono))
    target = 10.0 ** (NORM_DB / 20.0)
    safe_peak = jnp.where(peak > 0, peak, 1.0)                 # avoid inf/NaN path
    mono = mono * jnp.where(peak > 0, target / safe_peak, 1.0)

    # Spectrogram framing (center=True, reflect pad), torchaudio defaults
    pad = N_FFT // 2
    padded = jnp.pad(mono, (pad, pad), mode="reflect")
    num_frames = 1 + (padded.shape[0] - N_FFT) // HOP
    frames = _frame_signal(padded, num_frames)                 # (num_frames, n_fft)

    return logmel_pallas(frames)


if __name__ == "__main__":
    key = jax.random.PRNGKey(0)
    num_samples = 4000                                         # 0.25 s @ 16 kHz
    wav = jax.random.normal(key, (2, num_samples), dtype=jnp.float32)

    mel = wav2mel(wav, SAMPLE_RATE)
    jax.block_until_ready(mel)

    expected_frames = 1 + num_samples // HOP                   # 26
    assert mel.shape == (expected_frames, N_MELS), mel.shape
    assert bool(jnp.all(jnp.isfinite(mel)))
    print("KERNEL_OK")
</pallas_src>

<mosaic_0001>
module attributes {stable_mosaic.version = 11 : i64} {
  func.func @logmel_kernel(%arg0: i32, %arg1: memref<32x512xbf16, #tpu.memory_space<vmem>>, %arg2: memref<512x512xbf16, #tpu.memory_space<vmem>>, %arg3: memref<256x128xf32, #tpu.memory_space<vmem>>, %arg4: memref<32x128xf32, #tpu.memory_space<vmem>>) attributes {dimension_semantics = [#tpu.dimension_semantics<parallel>], iteration_bounds = array<i64: 1>, scalar_prefetch = 0 : i64, scratch_operands = 0 : i64, tpu.core_type = #tpu.core_type<tc>, window_params = [{transform_indices = @transform_0, window_bounds = array<i64: 32, 512>}, {pipeline_mode = #tpu.pipeline_mode<synchronous>, transform_indices = @transform_1, window_bounds = array<i64: 512, 512>}, {pipeline_mode = #tpu.pipeline_mode<synchronous>, transform_indices = @transform_2, window_bounds = array<i64: 256, 128>}, {transform_indices = @transform_3, window_bounds = array<i64: 32, 128>}]} {
    %c0 = arith.constant 0 : index
    %c0_0 = arith.constant 0 : index
    %0 = vector.load %arg1[%c0, %c0_0] : memref<32x512xbf16, #tpu.memory_space<vmem>>, vector<32x512xbf16>
    %c0_1 = arith.constant 0 : index
    %c0_2 = arith.constant 0 : index
    %1 = vector.load %arg2[%c0_1, %c0_2] : memref<512x512xbf16, #tpu.memory_space<vmem>>, vector<512x512xbf16>
    %cst = arith.constant dense<0.000000e+00> : vector<32x512xf32>
    %2 = tpu.matmul %0, %1, %cst {dimension_numbers = #tpu.dot_dimension_numbers<[1], [0], [0], [1], [0, 0, 1, 1], [], []>} : vector<32x512xbf16>, vector<512x512xbf16>, vector<32x512xf32> -> vector<32x512xf32>
    %3 = arith.mulf %2, %2 : vector<32x512xf32>
    %4 = vector.extract_strided_slice %3 {offsets = [0, 0], sizes = [32, 256], strides = [1, 1]} : vector<32x512xf32> to vector<32x256xf32>
    %5 = vector.extract_strided_slice %3 {offsets = [0, 256], sizes = [32, 256], strides = [1, 1]} : vector<32x512xf32> to vector<32x256xf32>
    %6 = arith.addf %4, %5 : vector<32x256xf32>
    %c0_3 = arith.constant 0 : index
    %c0_4 = arith.constant 0 : index
    %7 = vector.load %arg3[%c0_3, %c0_4] : memref<256x128xf32, #tpu.memory_space<vmem>>, vector<256x128xf32>
    %cst_5 = arith.constant dense<0.000000e+00> : vector<32x128xf32>
    %8 = tpu.matmul %6, %7, %cst_5 {dimension_numbers = #tpu.dot_dimension_numbers<[1], [0], [0], [1], [0, 0, 1, 1], [], []>} : vector<32x256xf32>, vector<256x128xf32>, vector<32x128xf32> -> vector<32x128xf32>
    %cst_6 = arith.constant 9.99999971E-10 : f32
    %9 = vector.broadcast %cst_6 : f32 to vector<32x128xf32>
    %10 = arith.maximumf %8, %9 : vector<32x128xf32>
    %11 = math.log %10 : vector<32x128xf32>
    %c0_7 = arith.constant 0 : index
    %c0_8 = arith.constant 0 : index
    %12 = vector.load %arg4[%c0_7, %c0_8] : memref<32x128xf32, #tpu.memory_space<vmem>>, vector<32x128xf32>
    tpu.vector_store %arg4[%c0_7, %c0_8], %11 {strides = array<i32>} : memref<32x128xf32, #tpu.memory_space<vmem>>, vector<32x128xf32>,
    return
  }
  func.func @transform_0(%arg0: i32) -> (i32, i32) {
    %c0_i32 = arith.constant 0 : i32
    %c0_i32_0 = arith.constant 0 : i32
    return %arg0, %c0_i32 : i32, i32
  }
  func.func @transform_1(%arg0: i32) -> (i32, i32) {
    %c0_i32 = arith.constant 0 : i32
    %c0_i32_0 = arith.constant 0 : i32
    %c0_i32_1 = arith.constant 0 : i32
    return %c0_i32, %c0_i32_0 : i32, i32
  }
  func.func @transform_2(%arg0: i32) -> (i32, i32) {
    %c0_i32 = arith.constant 0 : i32
    %c0_i32_0 = arith.constant 0 : i32
    %c0_i32_1 = arith.constant 0 : i32
    return %c0_i32, %c0_i32_0 : i32, i32
  }
  func.func @transform_3(%arg0: i32) -> (i32, i32) {
    %c0_i32 = arith.constant 0 : i32
    %c0_i32_0 = arith.constant 0 : i32
    return %arg0, %c0_i32 : i32, i32
  }
}

</mosaic_0001>

<bundles_post_ra>
// kernel: reverse
= control target key start
LH: loop header
LB: loop body
LE: loop exit
PB: predicated region body
PF: predicated region fallthrough
CT: control target
= control target key end

     0   :  { %v2_v0 = vlaneseq  ;;  %s150_s0 = inlined_call_operand.vmem [shape: bf16[256], index: 0, kind: input, shape index: {}]   ;;  %s151_s1 = inlined_call_operand.vmem [shape: bf16[256], index: 1, kind: output, shape index: {}]  }
   0x2   :  { %v3_v1 = vsub.s32 127, %v2_v0 }
   0x4   :  { %4 = vset.pattern.permute.xlu0 %v3_v1 }
   0x5   :  { %v64_v2 = vld [vmem:[#allocation1] sm:$0x1]  ;;  %v21_v3 = vld [vmem:[%s150_s0] sm:$0x1]  ;;  %v81_v12 = vshrl.u32 %v2_v0, 7  ;;  %v133_v15 = vmov 0.0  }
   0x6   :  { %v65_v4 = vunpack.c.l.bf16 %v64_v2  ;;  %22 = vst [vmem:[#allocation1 + $0x1] sm:$0x1] %v21_v3 }
   0x7   :  { %vm82_vm0 = vcmp.lt.s32.totalorder %v81_v12, 2 }
   0x8   :  { %67 = vst [vmem:[#allocation0] sm:$0x3] %v65_v4 }
   0xd   :  { %v50_v5 = vld [vmem:[#allocation1 + $0x1] sm:$0x1] }
   0xe   :  { %v51_v6 = vunpack.c.l.bf16 %v50_v5 }
   0xf   :  { %v69_v7 = vld [vmem:[#allocation0 + $0x7] ss:$-1 sm:$0xff] }
  0x10   :  { %v70_v8 = vrot.slane %v69_v7, 6  ;;  %54 = vst [vmem:[#allocation0 + $0x8] sm:$0x3] %v51_v6 }
  0x12   :  { %71 = vperm.xlu0 %4, %v70_v8  }
  0x17   :  { %v76_v9 = vld [vmem:[#allocation0 + $0xf] ss:$-1 sm:$0xff] }
  0x18   :  { %v77_v10 = vrot.slane %v76_v9, 6 }
  0x1a   :  { %78 = vperm.xlu0 %4, %v77_v10  }
  0x91   :  { %v72_v11 = vpop.permute.xlu0 %71 }
  0x92   :  { %73 = vst [vmem:[#allocation2] sm:$0xff] %v72_v11 }
  0x99   :  { %v79_v13 = vpop.permute.xlu0 %78 }
  0x9a   :  { %83 = vst.msk [vmem:[#allocation2] sm:$0xff] %vm82_vm0, %v79_v13 }
  0xa1   :  { %v88_v14 = vld [vmem:[#allocation2] sm:$0x3] }
  0xa2   :  { %v89_v16 = vpack.c.bf16 %v133_v15, %v88_v14 }
  0xa4   :  { %91 = vst [vmem:[#allocation3] sm:$0x1] %v89_v16 }
  0xab   :  { %v107_v17 = vld [vmem:[#allocation3] sm:$0x1] }
  0xac   :  { %108 = vst [vmem:[%s151_s1] sm:$0x1] %v107_v17 }

// kernel: wav2mel.1
= control target key start
LH: loop header
LB: loop body
LE: loop exit
PB: predicated region body
PF: predicated region fallthrough
CT: control target
= control target key end

     0   :  { %s2238_s0 = inlined_call_operand.vmem [shape: bf16[32,512], index: 0, kind: input, shape index: {}]   ;;  %s2239_s1 = inlined_call_operand.vmem [shape: bf16[512,512], index: 1, kind: input, shape index: {}]   ;;  %s2240_s2 = inlined_call_operand.vmem [shape: f32[256,128], index: 2, kind: input, shape index: {}]   ;;  %s2241_s3 = inlined_call_operand.hbm [shape: f32[32,128], index: 3, kind: output, shape index: {}]  }
   0x1   :  { %v1463_v0 = vld [vmem:[%s2239_s1 + $0x4] ss:$16 sps:$4 sm:$0xff]   ;;  %v1465_v1 = vld [vmem:[%s2239_s1 + $0xc] ss:$16 sps:$4 sm:$0xff]   ;;  %v1467_v2 = vld [vmem:[%s2239_s1] ss:$16 sps:$4 sm:$0xff]  }
   0x2   :  { %831 = vmatprep.subr.bf16.mxu0 %v1463_v0  ;;  %v1468_v3 = vld [vmem:[%s2239_s1 + $0x8] ss:$16 sps:$4 sm:$0xff]   ;;  %937 = vmatprep.subr.bf16.mxu1 %v1465_v1  ;;  %v1469_v4 = vld [vmem:[%s2239_s1 + $0x24] ss:$16 sps:$4 sm:$0xff]   ;;  %v1471_v5 = vld [vmem:[%s2239_s1 + $0x2c] ss:$16 sps:$4 sm:$0xff]  }
   0x3   :  { %832 = vmatpush1.bf16.msra.mxu0 %v1467_v2  ;;  %938 = vmatpush1.bf16.msra.mxu1 %v1468_v3  ;;  %v1473_v6 = vld [vmem:[%s2239_s1 + $0x20] ss:$16 sps:$4 sm:$0xff]   ;;  %v1474_v7 = vld [vmem:[%s2239_s1 + $0x28] ss:$16 sps:$4 sm:$0xff]   ;;  %v1475_v8 = vld [vmem:[%s2239_s1 + $0x44] ss:$16 sps:$4 sm:$0xff]  }
   0x4   :  { %833 = vmatprep.subr.bf16.mxu0 %v1469_v4  ;;  %939 = vmatprep.subr.bf16.mxu1 %v1471_v5  ;;  %v1477_v9 = vld [vmem:[%s2239_s1 + $0x4c] ss:$16 sps:$4 sm:$0xff]   ;;  %v1479_v10 = vld [vmem:[%s2239_s1 + $0x40] ss:$16 sps:$4 sm:$0xff]   ;;  %v1480_v11 = vld [vmem:[%s2239_s1 + $0x48] ss:$16 sps:$4 sm:$0xff]  }
   0x5   :  { %v1481_v12 = vld [vmem:[%s2239_s1 + $0x64] ss:$16 sps:$4 sm:$0xff]   ;;  %v1483_v13 = vld [vmem:[%s2239_s1 + $0x6c] ss:$16 sps:$4 sm:$0xff]   ;;  %v1485_v14 = vld [vmem:[%s2239_s1 + $0x60] ss:$16 sps:$4 sm:$0xff]  }
   0x6   :  { %v1486_v15 = vld [vmem:[%s2239_s1 + $0x68] ss:$16 sps:$4 sm:$0xff]   ;;  %v1487_v16 = vld [vmem:[%s2239_s1 + $0x84] ss:$16 sps:$4 sm:$0xff]   ;;  %v1489_v17 = vld [vmem:[%s2239_s1 + $0x8c] ss:$16 sps:$4 sm:$0xff]  }
   0x7   :  { %834 = vmatpush1.bf16.msra.mxu0 %v1473_v6  ;;  %940 = vmatpush1.bf16.msra.mxu1 %v1474_v7  ;;  %v1491_v18 = vld [vmem:[%s2239_s1 + $0x80] ss:$16 sps:$4 sm:$0xff]   ;;  %v1492_v19 = vld [vmem:[%s2239_s1 + $0x88] ss:$16 sps:$4 sm:$0xff]   ;;  %v1493_v20 = vld [vmem:[%s2239_s1 + $0xa4] ss:$16 sps:$4 sm:$0xff]  }
   0x8   :  { %835 = vmatprep.subr.bf16.mxu0 %v1475_v8  ;;  %941 = vmatprep.subr.bf16.mxu1 %v1477_v9  ;;  %v1495_v21 = vld [vmem:[%s2239_s1 + $0xac] ss:$16 sps:$4 sm:$0xff]   ;;  %v1497_v22 = vld [vmem:[%s2239_s1 + $0xa0] ss:$16 sps:$4 sm:$0xff]   ;;  %v1498_v23 = vld [vmem:[%s2239_s1 + $0xa8] ss:$16 sps:$4 sm:$0xff]  }
   0x9   :  { %v1499_v24 = vld [vmem:[%s2239_s1 + $0xc4] ss:$16 sps:$4 sm:$0xff]   ;;  %v1501_v25 = vld [vmem:[%s2239_s1 + $0xcc] ss:$16 sps:$4 sm:$0xff]   ;;  %v1503_v26 = vld [vmem:[%s2239_s1 + $0xc0] ss:$16 sps:$4 sm:$0xff]  }
   0xa   :  { %v1504_v27 = vld [vmem:[%s2239_s1 + $0xc8] ss:$16 sps:$4 sm:$0xff]   ;;  %v1505_v28 = vld [vmem:[%s2239_s1 + $0xe4] ss:$16 sps:$4 sm:$0xff]   ;;  %v1507_v29 = vld [vmem:[%s2239_s1 + $0xec] ss:$16 sps:$4 sm:$0xff]  }
   0xb   :  { %836 = vmatpush1.bf16.msra.mxu0 %v1479_v10  ;;  %942 = vmatpush1.bf16.msra.mxu1 %v1480_v11  ;;  %v1509_v30 = vld [vmem:[%s2239_s1 + $0xe0] ss:$16 sps:$4 sm:$0xff]   ;;  %v1510_v31 = vld [vmem:[%s2239_s1 + $0xe8] ss:$16 sps:$4 sm:$0xff]   ;;  %v1511_v32 = vld [vmem:[%s2239_s1 + $0x104] ss:$16 sps:$4 sm:$0xff]  }
   0xc   :  { %837 = vmatprep.subr.bf16.mxu0 %v1481_v12  ;;  %943 = vmatprep.subr.bf16.mxu1 %v1483_v13  ;;  %v1513_v33 = vld [vmem:[%s2239_s1 + $0x10c] ss:$16 sps:$4 sm:$0xff]   ;;  %v1515_v34 = vld [vmem:[%s2239_s1 + $0x100] ss:$16 sps:$4 sm:$0xff]   ;;  %v1516_v35 = vld [vmem:[%s2239_s1 + $0x108] ss:$16 sps:$4 sm:$0xff]  }
   0xd   :  { %v1517_v36 = vld [vmem:[%s2239_s1 + $0x124] ss:$16 sps:$4 sm:$0xff]   ;;  %v1519_v37 = vld [vmem:[%s2239_s1 + $0x12c] ss:$16 sps:$4 sm:$0xff]   ;;  %v1521_v38 = vld [vmem:[%s2239_s1 + $0x120] ss:$16 sps:$4 sm:$0xff]  }
   0xe   :  { %v1522_v39 = vld [vmem:[%s2239_s1 + $0x128] ss:$16 sps:$4 sm:$0xff]   ;;  %v1523_v40 = vld [vmem:[%s2239_s1 + $0x144] ss:$16 sps:$4 sm:$0xff]   ;;  %v1525_v41 = vld [vmem:[%s2239_s1 + $0x14c] ss:$16 sps:$4 sm:$0xff]  }
   0xf   :  { %838 = vmatpush1.bf16.msra.mxu0 %v1485_v14  ;;  %944 = vmatpush1.bf16.msra.mxu1 %v1486_v15  ;;  %v1527_v42 = vld [vmem:[%s2239_s1 + $0x140] ss:$16 sps:$4 sm:$0xff]   ;;  %v1528_v43 = vld [vmem:[%s2239_s1 + $0x148] ss:$16 sps:$4 sm:$0xff]   ;;  %v1529_v44 = vld [vmem:[%s2239_s1 + $0x164] ss:$16 sps:$4 sm:$0xff]  }
  0x10   :  { %839 = vmatprep.subr.bf16.mxu0 %v1487_v16  ;;  %945 = vmatprep.subr.bf16.mxu1 %v1489_v17  ;;  %v1531_v45 = vld [vmem:[%s2239_s1 + $0x16c] ss:$16 sps:$4 sm:$0xff]   ;;  %v1533_v46 = vld [vmem:[%s2239_s1 + $0x160] ss:$16 sps:$4 sm:$0xff]   ;;  %v1534_v47 = vld [vmem:[%s2239_s1 + $0x168] ss:$16 sps:$4 sm:$0xff]  }
  0x11   :  { %v1561_v48 = vld [vmem:[%s2238_s0 + $0x4] ss:$16 sps:$4 sm:$0xff]   ;;  %v1537_v50 = vld [vmem:[%s2239_s1 + $0x18c] ss:$16 sps:$4 sm:$0xff]   ;;  %v1539_v51 = vld [vmem:[%s2239_s1 + $0x180] ss:$16 sps:$4 sm:$0xff]  }
  0x12   :  { %v1535_v49 = vld [vmem:[%s2239_s1 + $0x184] ss:$16 sps:$4 sm:$0xff]   ;;  %863 = vmatprep.mubr.bf16.mxu0 %v1561_v48  ;;  %969 = vmatprep.mubr.bf16.mxu1 %v1561_v48  ;;  %v1540_v52 = vld [vmem:[%s2239_s1 + $0x188] ss:$16 sps:$4 sm:$0xff]   ;;  %v1543_v54 = vld [vmem:[%s2239_s1 + $0x1ac] ss:$16 sps:$4 sm:$0xff]  }
  0x13   :  { %840 = vmatpush1.bf16.msra.mxu0 %v1491_v18  ;;  %946 = vmatpush1.bf16.msra.mxu1 %v1492_v19  ;;  %v1541_v53 = vld [vmem:[%s2239_s1 + $0x1a4] ss:$16 sps:$4 sm:$0xff]   ;;  %v1545_v55 = vld [vmem:[%s2239_s1 + $0x1a0] ss:$16 sps:$4 sm:$0xff]   ;;  %v1546_v56 = vld [vmem:[%s2239_s1 + $0x1a8] ss:$16 sps:$4 sm:$0xff]  }
  0x14   :  { %841 = vmatprep.subr.bf16.mxu0 %v1493_v20  ;;  %947 = vmatprep.subr.bf16.mxu1 %v1495_v21  ;;  %v1547_v57 = vld [vmem:[%s2239_s1 + $0x1c4] ss:$16 sps:$4 sm:$0xff]   ;;  %v1549_v58 = vld [vmem:[%s2239_s1 + $0x1cc] ss:$16 sps:$4 sm:$0xff]   ;;  %v1551_v59 = vld [vmem:[%s2239_s1 + $0x1c0] ss:$16 sps:$4 sm:$0xff]  }
  0x15   :  { %v1552_v60 = vld [vmem:[%s2239_s1 + $0x1c8] ss:$16 sps:$4 sm:$0xff]   ;;  %v1553_v61 = vld [vmem:[%s2239_s1 + $0x1e4] ss:$16 sps:$4 sm:$0xff]   ;;  %v1555_v62 = vld [vmem:[%s2239_s1 + $0x1ec] ss:$16 sps:$4 sm:$0xff]  }
  0x16   :  { %v1557_v63 = vld [vmem:[%s2239_s1 + $0x1e0] ss:$16 sps:$4 sm:$0xff]   ;;  %v1558_v0 = vld [vmem:[%s2239_s1 + $0x1e8] ss:$16 sps:$4 sm:$0xff]   ;;  %v1564_v1 = vld [vmem:[%s2239_s1 + $0x204] ss:$16 sps:$4 sm:$0xff]  }
  0x17   :  { %842 = vmatpush1.bf16.msra.mxu0 %v1497_v22  ;;  %948 = vmatpush1.bf16.msra.mxu1 %v1498_v23  ;;  %v1567_v2 = vld [vmem:[%s2239_s1 + $0x20c] ss:$16 sps:$4 sm:$0xff]   ;;  %v1559_v3 = vld [vmem:[%s2238_s0] ss:$16 sps:$4 sm:$0xff]   ;;  %v1565_v5 = vld [vmem:[%s2239_s1 + $0x208] ss:$16 sps:$4 sm:$0xff]  }
  0x18   :  { %843 = vmatprep.subr.bf16.mxu0 %v1499_v24  ;;  %949 = vmatprep.subr.bf16.mxu1 %v1501_v25  ;;  %v1562_v4 = vld [vmem:[%s2239_s1 + $0x200] ss:$16 sps:$4 sm:$0xff]   ;;  %v1570_v6 = vld [vmem:[%s2239_s1 + $0x224] ss:$16 sps:$4 sm:$0xff]   ;;  %v1573_v7 = vld [vmem:[%s2239_s1 + $0x22c] ss:$16 sps:$4 sm:$0xff]  }
  0x19   :  { %v1568_v8 = vld [vmem:[%s2239_s1 + $0x220] ss:$16 sps:$4 sm:$0xff]   ;;  %v1571_v9 = vld [vmem:[%s2239_s1 + $0x228] ss:$16 sps:$4 sm:$0xff]   ;;  %v1576_v10 = vld [vmem:[%s2239_s1 + $0x244] ss:$16 sps:$4 sm:$0xff]  }
  0x1a   :  { %v1579_v11 = vld [vmem:[%s2239_s1 + $0x24c] ss:$16 sps:$4 sm:$0xff]   ;;  %v1574_v12 = vld [vmem:[%s2239_s1 + $0x240] ss:$16 sps:$4 sm:$0xff]   ;;  %v1577_v13 = vld [vmem:[%s2239_s1 + $0x248] ss:$16 sps:$4 sm:$0xff]  }
  0x1b   :  { %844 = vmatpush1.bf16.msra.mxu0 %v1503_v26  ;;  %950 = vmatpush1.bf16.msra.mxu1 %v1504_v27  ;;  %v1582_v14 = vld [vmem:[%s2239_s1 + $0x264] ss:$16 sps:$4 sm:$0xff]   ;;  %v1585_v15 = vld [vmem:[%s2239_s1 + $0x26c] ss:$16 sps:$4 sm:$0xff]   ;;  %v1580_v16 = vld [vmem:[%s2239_s1 + $0x260] ss:$16 sps:$4 sm:$0xff]  }
  0x1c   :  { %845 = vmatprep.subr.bf16.mxu0 %v1505_v28  ;;  %951 = vmatprep.subr.bf16.mxu1 %v1507_v29  ;;  %v1583_v17 = vld [vmem:[%s2239_s1 + $0x268] ss:$16 sps:$4 sm:$0xff]   ;;  %v1588_v18 = vld [vmem:[%s2239_s1 + $0x284] ss:$16 sps:$4 sm:$0xff]   ;;  %v1591_v19 = vld [vmem:[%s2239_s1 + $0x28c] ss:$16 sps:$4 sm:$0xff]  }
  0x1d   :  { %v1586_v20 = vld [vmem:[%s2239_s1 + $0x280] ss:$16 sps:$4 sm:$0xff]   ;;  %v1589_v21 = vld [vmem:[%s2239_s1 + $0x288] ss:$16 sps:$4 sm:$0xff]   ;;  %v1594_v22 = vld [vmem:[%s2239_s1 + $0x2a4] ss:$16 sps:$4 sm:$0xff]  }
  0x1e   :  { %v1597_v23 = vld [vmem:[%s2239_s1 + $0x2ac] ss:$16 sps:$4 sm:$0xff]   ;;  %v1592_v24 = vld [vmem:[%s2239_s1 + $0x2a0] ss:$16 sps:$4 sm:$0xff]   ;;  %v1646_v25 = vld [vmem:[%s2238_s0 + $0x24] ss:$16 sps:$4 sm:$0xff]  }
  0x1f   :  { %846 = vmatpush1.bf16.msra.mxu0 %v1509_v30  ;;  %952 = vmatpush1.bf16.msra.mxu1 %v1510_v31  ;;  %v1595_v26 = vld [vmem:[%s2239_s1 + $0x2a8] ss:$16 sps:$4 sm:$0xff]   ;;  %v1648_v27 = vld [vmem:[%s2238_s0 + $0x20] ss:$16 sps:$4 sm:$0xff]   ;;  %v1600_v28 = vld [vmem:[%s2239_s1 + $0x2c4] ss:$16 sps:$4 sm:$0xff]  }
  0x20   :  { %847 = vmatprep.subr.bf16.mxu0 %v1511_v32  ;;  %953 = vmatprep.subr.bf16.mxu1 %v1513_v33  ;;  %v1603_v29 = vld [vmem:[%s2239_s1 + $0x2cc] ss:$16 sps:$4 sm:$0xff]   ;;  %v1598_v30 = vld [vmem:[%s2239_s1 + $0x2c0] ss:$16 sps:$4 sm:$0xff]   ;;  %v1601_v31 = vld [vmem:[%s2239_s1 + $0x2c8] ss:$16 sps:$4 sm:$0xff]  }
  0x21   :  { %v1606_v32 = vld [vmem:[%s2239_s1 + $0x2e4] ss:$16 sps:$4 sm:$0xff]   ;;  %v1609_v33 = vld [vmem:[%s2239_s1 + $0x2ec] ss:$16 sps:$4 sm:$0xff]  }
  0x23   :  { %848 = vmatpush1.bf16.msra.mxu0 %v1515_v34  ;;  %954 = vmatpush1.bf16.msra.mxu1 %v1516_v35  ;;  %v1663_v34 = vld [vmem:[%s2238_s0 + $0xc] ss:$16 sps:$4 sm:$0xff]   ;;  %v1604_v35 = vld [vmem:[%s2239_s1 + $0x2e0] ss:$16 sps:$4 sm:$0xff]  }
  0x24   :  { %849 = vmatprep.subr.bf16.mxu0 %v1517_v36  ;;  %955 = vmatprep.subr.bf16.mxu1 %v1519_v37  ;;  %v1607_v36 = vld [vmem:[%s2239_s1 + $0x2e8] ss:$16 sps:$4 sm:$0xff]   ;;  %v1612_v37 = vld [vmem:[%s2239_s1 + $0x304] ss:$16 sps:$4 sm:$0xff]  }
  0x27   :  { %850 = vmatpush1.bf16.msra.mxu0 %v1521_v38  ;;  %956 = vmatpush1.bf16.msra.mxu1 %v1522_v39  ;;  %v1615_v38 = vld [vmem:[%s2239_s1 + $0x30c] ss:$16 sps:$4 sm:$0xff]   ;;  %v1610_v39 = vld [vmem:[%s2239_s1 + $0x300] ss:$16 sps:$4 sm:$0xff]  }
  0x28   :  { %851 = vmatprep.subr.bf16.mxu0 %v1523_v40  ;;  %957 = vmatprep.subr.bf16.mxu1 %v1525_v41  ;;  %v1613_v40 = vld [vmem:[%s2239_s1 + $0x308] ss:$16 sps:$4 sm:$0xff]   ;;  %v1618_v41 = vld [vmem:[%s2239_s1 + $0x324] ss:$16 sps:$4 sm:$0xff]  }
  0x2b   :  { %852 = vmatpush1.bf16.msra.mxu0 %v1527_v42  ;;  %958 = vmatpush1.bf16.msra.mxu1 %v1528_v43  ;;  %v1621_v42 = vld [vmem:[%s2239_s1 + $0x32c] ss:$16 sps:$4 sm:$0xff]  }
  0x2c   :  { %853 = vmatprep.subr.bf16.mxu0 %v1529_v44  ;;  %959 = vmatprep.subr.bf16.mxu1 %v1531_v45 }
  0x2f   :  { %854 = vmatpush1.bf16.msra.mxu0 %v1533_v46  ;;  %960 = vmatpush1.bf16.msra.mxu1 %v1534_v47 }
  0x30   :  { %855 = vmatprep.subr.bf16.mxu0 %v1535_v49  ;;  %961 = vmatprep.subr.bf16.mxu1 %v1537_v50 }
  0x33   :  { %856 = vmatpush1.bf16.msra.mxu0 %v1539_v51  ;;  %962 = vmatpush1.bf16.msra.mxu1 %v1540_v52 }
  0x34   :  { %857 = vmatprep.subr.bf16.mxu0 %v1541_v53  ;;  %963 = vmatprep.subr.bf16.mxu1 %v1543_v54 }
  0x37   :  { %858 = vmatpush1.bf16.msra.mxu0 %v1545_v55  ;;  %964 = vmatpush1.bf16.msra.mxu1 %v1546_v56 }
  0x38   :  { %859 = vmatprep.subr.bf16.mxu0 %v1547_v57  ;;  %965 = vmatprep.subr.bf16.mxu1 %v1549_v58 }
  0x3b   :  { %860 = vmatpush1.bf16.msra.mxu0 %v1551_v59  ;;  %966 = vmatpush1.bf16.msra.mxu1 %v1552_v60 }
  0x3c   :  { %861 = vmatprep.subr.bf16.mxu0 %v1553_v61  ;;  %967 = vmatprep.subr.bf16.mxu1 %v1555_v62 }
  0x3f   :  { %862 = vmatpush1.bf16.msra.mxu0 %v1557_v63  ;;  %968 = vmatpush1.bf16.msra.mxu1 %v1558_v0 }
  0x40   :  { %884 = vmatprep.subr.bf16.mxu0 %v1564_v1  ;;  %990 = vmatprep.subr.bf16.mxu1 %v1567_v2 }
  0x42   :  { %864 = vmatmul.mubr.bf16.vlgmr.msra.gmra.mrb[0].mxu0 %v1559_v3  ;;  %970 = vmatmul.mubr.bf16.vlgmr.msra.gmra.mrb[0].mxu1 %v1559_v3 }
  0x43   :  { %885 = vmatpush1.bf16.msra.mxu0 %v1562_v4  ;;  %991 = vmatpush1.bf16.msra.mxu1 %v1565_v5 }
  0x44   :  { %886 = vmatprep.subr.bf16.mxu0 %v1570_v6  ;;  %992 = vmatprep.subr.bf16.mxu1 %v1573_v7 }
  0x45   :  { %873 = vmatprep.mubr.bf16.mxu0 %v1646_v25  ;;  %979 = vmatprep.mubr.bf16.mxu1 %v1646_v25 }
  0x47   :  { %887 = vmatpush1.bf16.msra.mxu0 %v1568_v8  ;;  %993 = vmatpush1.bf16.msra.mxu1 %v1571_v9 }
  0x48   :  { %888 = vmatprep.subr.bf16.mxu0 %v1576_v10  ;;  %994 = vmatprep.subr.bf16.mxu1 %v1579_v11 }
  0x4a   :  { %874 = vmatmul.mubr.bf16.gmra.mrb[4].mxu0 %v1648_v27  ;;  %980 = vmatmul.mubr.bf16.gmra.mrb[4].mxu1 %v1648_v27 }
  0x4b   :  { %889 = vmatpush1.bf16.msra.mxu0 %v1574_v12  ;;  %995 = vmatpush1.bf16.msra.mxu1 %v1577_v13 }
  0x4c   :  { %890 = vmatprep.subr.bf16.mxu0 %v1582_v14  ;;  %996 = vmatprep.subr.bf16.mxu1 %v1585_v15 }
  0x4d   :  { %916 = vmatprep.mubr.bf16.mxu0 %v1663_v34  ;;  %1022 = vmatprep.mubr.bf16.mxu1 %v1663_v34 }
  0x4f   :  { %891 = vmatpush1.bf16.msra.mxu0 %v1580_v16  ;;  %997 = vmatpush1.bf16.msra.mxu1 %v1583_v17 }
  0x50   :  { %892 = vmatprep.subr.bf16.mxu0 %v1588_v18  ;;  %998 = vmatprep.subr.bf16.mxu1 %v1591_v19 }
  0x53   :  { %893 = vmatpush1.bf16.msra.mxu0 %v1586_v20  ;;  %999 = vmatpush1.bf16.msra.mxu1 %v1589_v21 }
  0x54   :  { %894 = vmatprep.subr.bf16.mxu0 %v1594_v22  ;;  %1000 = vmatprep.subr.bf16.mxu1 %v1597_v23 }
  0x57   :  { %895 = vmatpush1.bf16.msra.mxu0 %v1592_v24  ;;  %1001 = vmatpush1.bf16.msra.mxu1 %v1595_v26 }
  0x58   :  { %896 = vmatprep.subr.bf16.mxu0 %v1600_v28  ;;  %1002 = vmatprep.subr.bf16.mxu1 %v1603_v29 }
  0x5b   :  { %897 = vmatpush1.bf16.msra.mxu0 %v1598_v30  ;;  %1003 = vmatpush1.bf16.msra.mxu1 %v1601_v31 }
  0x5c   :  { %898 = vmatprep.subr.bf16.mxu0 %v1606_v32  ;;  %1004 = vmatprep.subr.bf16.mxu1 %v1609_v33 }
  0x5f   :  { %899 = vmatpush1.bf16.msra.mxu0 %v1604_v35  ;;  %1005 = vmatpush1.bf16.msra.mxu1 %v1607_v36 }
  0x60   :  { %900 = vmatprep.subr.bf16.mxu0 %v1612_v37  ;;  %1006 = vmatprep.subr.bf16.mxu1 %v1615_v38 }
  0x61   :  { %8 = vsyncpa [#allocation3], 0  ;;  %v1616_v43 = vld [vmem:[%s2239_s1 + $0x320] ss:$16 sps:$4 sm:$0xff]   ;;  %v1619_v44 = vld [vmem:[%s2239_s1 + $0x328] ss:$16 sps:$4 sm:$0xff]  }
  0x62   :  { %v1624_v45 = vld [vmem:[%s2239_s1 + $0x344] ss:$16 sps:$4 sm:$0xff]   ;;  %v1627_v46 = vld [vmem:[%s2239_s1 + $0x34c] ss:$16 sps:$4 sm:$0xff]   ;;  %v1622_v47 = vld [vmem:[%s2239_s1 + $0x340] ss:$16 sps:$4 sm:$0xff]  }
  0x63   :  { %901 = vmatpush1.bf16.msra.mxu0 %v1610_v39  ;;  %1007 = vmatpush1.bf16.msra.mxu1 %v1613_v40  ;;  %v1625_v48 = vld [vmem:[%s2239_s1 + $0x348] ss:$16 sps:$4 sm:$0xff]   ;;  %v1630_v49 = vld [vmem:[%s2239_s1 + $0x364] ss:$16 sps:$4 sm:$0xff]   ;;  %v1633_v50 = vld [vmem:[%s2239_s1 + $0x36c] ss:$16 sps:$4 sm:$0xff]  }
  0x64   :  { %902 = vmatprep.subr.bf16.mxu0 %v1618_v41  ;;  %1008 = vmatprep.subr.bf16.mxu1 %v1621_v42  ;;  %v1628_v51 = vld [vmem:[%s2239_s1 + $0x360] ss:$16 sps:$4 sm:$0xff]   ;;  %v1631_v52 = vld [vmem:[%s2239_s1 + $0x368] ss:$16 sps:$4 sm:$0xff]   ;;  %v1636_v53 = vld [vmem:[%s2239_s1 + $0x384] ss:$16 sps:$4 sm:$0xff]  }
  0x65   :  { %v1639_v54 = vld [vmem:[%s2239_s1 + $0x38c] ss:$16 sps:$4 sm:$0xff]   ;;  %v1634_v55 = vld [vmem:[%s2239_s1 + $0x380] ss:$16 sps:$4 sm:$0xff]   ;;  %v1637_v56 = vld [vmem:[%s2239_s1 + $0x388] ss:$16 sps:$4 sm:$0xff]  }
  0x66   :  { %v1642_v57 = vld [vmem:[%s2239_s1 + $0x3a4] ss:$16 sps:$4 sm:$0xff]   ;;  %v1645_v58 = vld [vmem:[%s2239_s1 + $0x3ac] ss:$16 sps:$4 sm:$0xff]   ;;  %v1640_v59 = vld [vmem:[%s2239_s1 + $0x3a0] ss:$16 sps:$4 sm:$0xff]  }
  0x67   :  { %903 = vmatpush1.bf16.msra.mxu0 %v1616_v43  ;;  %1009 = vmatpush1.bf16.msra.mxu1 %v1619_v44  ;;  %v1643_v60 = vld [vmem:[%s2239_s1 + $0x3a8] ss:$16 sps:$4 sm:$0xff]   ;;  %v1651_v61 = vld [vmem:[%s2239_s1 + $0x3c4] ss:$16 sps:$4 sm:$0xff]   ;;  %v1654_v62 = vld [vmem:[%s2239_s1 + $0x3cc] ss:$16 sps:$4 sm:$0xff]  }
  0x68   :  { %904 = vmatprep.subr.bf16.mxu0 %v1624_v45  ;;  %1010 = vmatprep.subr.bf16.mxu1 %v1627_v46  ;;  %v1649_v63 = vld [vmem:[%s2239_s1 + $0x3c0] ss:$16 sps:$4 sm:$0xff]   ;;  %v1652_v0 = vld [vmem:[%s2239_s1 + $0x3c8] ss:$16 sps:$4 sm:$0xff]   ;;  %v1657_v1 = vld [vmem:[%s2239_s1 + $0x3e4] ss:$16 sps:$4 sm:$0xff]  }
  0x69   :  { %v1660_v2 = vld [vmem:[%s2239_s1 + $0x3ec] ss:$16 sps:$4 sm:$0xff]   ;;  %v1083_v3 = vld [vmem:[%s2240_s2 + $0x80] sm:$0xff]  ;;  %v1658_v6 = vld [vmem:[%s2239_s1 + $0x3e8] ss:$16 sps:$4 sm:$0xff]  }
  0x6a   :  { %v1084_v4 = vld [vmem:[%s2240_s2 + $0x88] sm:$0xff]  ;;  %v1655_v5 = vld [vmem:[%s2239_s1 + $0x3e0] ss:$16 sps:$4 sm:$0xff]   ;;  %v1086_v12 = vld [vmem:[%s2240_s2 + $0x98] sm:$0xff] }
  0x6b   :  { %905 = vmatpush1.bf16.msra.mxu0 %v1622_v47  ;;  %1011 = vmatpush1.bf16.msra.mxu1 %v1625_v48  ;;  %v1396_v7 = vpack.c.bf16 %v1084_v4, %v1083_v3  ;;  %v1067_v8 = vld [vmem:[%s2240_s2] sm:$0xff]  ;;  %v1068_v9 = vld [vmem:[%s2240_s2 + $0x8] sm:$0xff]  ;;  %v1085_v11 = vld [vmem:[%s2240_s2 + $0x90] sm:$0xff] }
  0x6c   :  { %906 = vmatprep.subr.bf16.mxu0 %v1630_v49  ;;  %1012 = vmatprep.subr.bf16.mxu1 %v1633_v50  ;;  %v1661_v10 = vld [vmem:[%s2238_s0 + $0x8] ss:$16 sps:$4 sm:$0xff]   ;;  %v1664_v13 = vld [vmem:[%s2238_s0 + $0x2c] ss:$16 sps:$4 sm:$0xff]   ;;  %v1398_v14 = vpack.c.bf16 %v1068_v9, %v1067_v8  ;;  %v1400_v15 = vpack.c.bf16 %v1086_v12, %v1085_v11  ;;  %v1069_v16 = vld [vmem:[%s2240_s2 + $0x10] sm:$0xff] }
  0x6d   :  { %v1070_v17 = vld [vmem:[%s2240_s2 + $0x18] sm:$0xff]  ;;  %v1087_v18 = vld [vmem:[%s2240_s2 + $0xa0] sm:$0xff]  ;;  %v1088_v19 = vld [vmem:[%s2240_s2 + $0xa8] sm:$0xff] }
  0x6e   :  { %v1402_v20 = vpack.c.bf16 %v1070_v17, %v1069_v16  ;;  %v1404_v21 = vpack.c.bf16 %v1088_v19, %v1087_v18  ;;  %v1071_v22 = vld [vmem:[%s2240_s2 + $0x20] sm:$0xff]  ;;  %v1072_v23 = vld [vmem:[%s2240_s2 + $0x28] sm:$0xff]  ;;  %v1089_v25 = vld [vmem:[%s2240_s2 + $0xb0] sm:$0xff] }
  0x6f   :  { %907 = vmatpush1.bf16.msra.mxu0 %v1628_v51  ;;  %1013 = vmatpush1.bf16.msra.mxu1 %v1631_v52  ;;  %v1666_v24 = vld [vmem:[%s2238_s0 + $0x28] ss:$16 sps:$4 sm:$0xff]   ;;  %v1406_v27 = vpack.c.bf16 %v1072_v23, %v1071_v22  ;;  %v1073_v29 = vld [vmem:[%s2240_s2 + $0x30] sm:$0xff]  ;;  %v1091_v31 = vld [vmem:[%s2240_s2 + $0xc0] sm:$0xff] }
  0x70   :  { %908 = vmatprep.subr.bf16.mxu0 %v1636_v53  ;;  %1014 = vmatprep.subr.bf16.mxu1 %v1639_v54  ;;  %v1090_v26 = vld [vmem:[%s2240_s2 + $0xb8] sm:$0xff]  ;;  %v1092_v32 = vld [vmem:[%s2240_s2 + $0xc8] sm:$0xff]  ;;  %v1075_v35 = vld [vmem:[%s2240_s2 + $0x40] sm:$0xff] }
  0x71   :  { %v1408_v28 = vpack.c.bf16 %v1090_v26, %v1089_v25  ;;  %v1074_v30 = vld [vmem:[%s2240_s2 + $0x38] sm:$0xff]  ;;  %v1412_v34 = vpack.c.bf16 %v1092_v32, %v1091_v31  ;;  %v1076_v36 = vld [vmem:[%s2240_s2 + $0x48] sm:$0xff]  ;;  %v1093_v37 = vld [vmem:[%s2240_s2 + $0xd0] sm:$0xff] }
  0x72   :  { %v1410_v33 = vpack.c.bf16 %v1074_v30, %v1073_v29  ;;  %v1094_v38 = vld [vmem:[%s2240_s2 + $0xd8] sm:$0xff]  ;;  %v1414_v39 = vpack.c.bf16 %v1076_v36, %v1075_v35  ;;  %v1077_v41 = vld [vmem:[%s2240_s2 + $0x50] sm:$0xff]  ;;  %v1095_v43 = vld [vmem:[%s2240_s2 + $0xe0] sm:$0xff] }
  0x73   :  { %909 = vmatpush1.bf16.msra.mxu0 %v1634_v55  ;;  %1015 = vmatpush1.bf16.msra.mxu1 %v1637_v56  ;;  %v1416_v40 = vpack.c.bf16 %v1094_v38, %v1093_v37  ;;  %v1078_v42 = vld [vmem:[%s2240_s2 + $0x58] sm:$0xff]  ;;  %v1096_v44 = vld [vmem:[%s2240_s2 + $0xe8] sm:$0xff]  ;;  %v1079_v47 = vld [vmem:[%s2240_s2 + $0x60] sm:$0xff] }
  0x74   :  { %910 = vmatprep.subr.bf16.mxu0 %v1642_v57  ;;  %1016 = vmatprep.subr.bf16.mxu1 %v1645_v58  ;;  %v1418_v45 = vpack.c.bf16 %v1078_v42, %v1077_v41  ;;  %v1420_v46 = vpack.c.bf16 %v1096_v44, %v1095_v43  ;;  %v1080_v48 = vld [vmem:[%s2240_s2 + $0x68] sm:$0xff]  ;;  %v1097_v50 = vld [vmem:[%s2240_s2 + $0xf0] sm:$0xff]  ;;  %v1098_v51 = vld [vmem:[%s2240_s2 + $0xf8] sm:$0xff] }
  0x75   :  { %v1422_v49 = vpack.c.bf16 %v1080_v48, %v1079_v47  ;;  %v1424_v52 = vpack.c.bf16 %v1098_v51, %v1097_v50  ;;  %v1081_v53 = vld [vmem:[%s2240_s2 + $0x70] sm:$0xff]  ;;  %v1082_v54 = vld [vmem:[%s2240_s2 + $0x78] sm:$0xff]  ;;  %s1699_s2 = smov [#allocation2]  }
  0x76   :  { %v1426_v55 = vpack.c.bf16 %v1082_v54, %v1081_v53  ;;  %s1205_s1 = sshll.u32 %s1699_s2, 4  ;;  %s1206_s1 = int_to_ptr.vmem [resolvable:$true] %s1205_s1 }
  0x77   :  { %911 = vmatpush1.bf16.msra.mxu0 %v1640_v59  ;;  %1017 = vmatpush1.bf16.msra.mxu1 %v1643_v60  ;;  %s1675_s20 = scalar_lea.vmem %s1206_s1, 512  ;;  %p1680_p1 = scmp.lt.s32.totalorder %s1206_s1, %s1206_s1 }
  0x78   :  { %912 = vmatprep.subr.bf16.mxu0 %v1651_v61  ;;  %1018 = vmatprep.subr.bf16.mxu1 %v1654_v62  ;;  %p1676_p0 = scmp.ne.s32.totalorder %s1206_s1, %s1675_s20  ;;  %p1681_p2 = scmp.lt.s32.totalorder %s1675_s20, %s1675_s20 }
  0x7a   :  { %p1682_p3 = por %p1681_p2, %p1680_p1 }
  0x7b   :  { %913 = vmatpush1.bf16.msra.mxu0 %v1649_v63  ;;  %1019 = vmatpush1.bf16.msra.mxu1 %v1652_v0 }
  0x7c   :  { %914 = vmatprep.subr.bf16.mxu0 %v1657_v1  ;;  %1020 = vmatprep.subr.bf16.mxu1 %v1660_v2  ;;  %p1683_p4 = pnand %p1682_p3, %p1676_p0 }
  0x7f   :  { %915 = vmatpush1.bf16.msra.mxu0 %v1655_v5  ;;  %1021 = vmatpush1.bf16.msra.mxu1 %v1658_v6 }
  0x80   :  { %1397 = vmatprep.subr.bf16.mxu0 %v1396_v7  ;;  %1428 = vmatprep.subr.bf16.mxu1 %v1396_v7 }
  0x82   :  { %917 = vmatmul.mubr.bf16.vlgmr.msra.gmra.mrb[0].mxu0 %v1661_v10  ;;  %1023 = vmatmul.mubr.bf16.vlgmr.msra.gmra.mrb[0].mxu1 %v1661_v10 }
  0x83   :  { %926 = vmatprep.mubr.bf16.mxu0 %v1664_v13  ;;  %1032 = vmatprep.mubr.bf16.mxu1 %v1664_v13 }
  0x84   :  { %1399 = vmatpush3.bf16.msra.mxu0 %v1398_v14  ;;  %1436 = vmatpush3.bf16.msra.mxu1 %v1398_v14 }
  0x85   :  { %1401 = vmatprep.subr.bf16.mxu0 %v1400_v15  ;;  %1429 = vmatprep.subr.bf16.mxu1 %v1400_v15 }
  0x88   :  { %1403 = vmatpush3.bf16.msra.mxu0 %v1402_v20  ;;  %1437 = vmatpush3.bf16.msra.mxu1 %v1402_v20 }
  0x89   :  { %1405 = vmatprep.subr.bf16.mxu0 %v1404_v21  ;;  %1430 = vmatprep.subr.bf16.mxu1 %v1404_v21 }
  0x8a   :  { %927 = vmatmul.mubr.bf16.gmra.mrb[4].mxu0 %v1666_v24  ;;  %1033 = vmatmul.mubr.bf16.gmra.mrb[4].mxu1 %v1666_v24 }
  0x8c   :  { %1407 = vmatpush3.bf16.msra.mxu0 %v1406_v27  ;;  %1438 = vmatpush3.bf16.msra.mxu1 %v1406_v27 }
  0x8d   :  { %1409 = vmatprep.subr.bf16.mxu0 %v1408_v28  ;;  %1431 = vmatprep.subr.bf16.mxu1 %v1408_v28 }
  0x90   :  { %1411 = vmatpush3.bf16.msra.mxu0 %v1410_v33  ;;  %1439 = vmatpush3.bf16.msra.mxu1 %v1410_v33 }
  0x91   :  { %1413 = vmatprep.subr.bf16.mxu0 %v1412_v34  ;;  %1432 = vmatprep.subr.bf16.mxu1 %v1412_v34 }
  0x94   :  { %1415 = vmatpush3.bf16.msra.mxu0 %v1414_v39  ;;  %1440 = vmatpush3.bf16.msra.mxu1 %v1414_v39 }
  0x95   :  { %1417 = vmatprep.subr.bf16.mxu0 %v1416_v40  ;;  %1433 = vmatprep.subr.bf16.mxu1 %v1416_v40 }
  0x98   :  { %1419 = vmatpush3.bf16.msra.mxu0 %v1418_v45  ;;  %1441 = vmatpush3.bf16.msra.mxu1 %v1418_v45 }
  0x99   :  { %1421 = vmatprep.subr.bf16.mxu0 %v1420_v46  ;;  %1434 = vmatprep.subr.bf16.mxu1 %v1420_v46 }
  0x9c   :  { %1423 = vmatpush3.bf16.msra.mxu0 %v1422_v49  ;;  %1442 = vmatpush3.bf16.msra.mxu1 %v1422_v49 }
  0x9d   :  { %1425 = vmatprep.subr.bf16.mxu0 %v1424_v52  ;;  %1435 = vmatprep.subr.bf16.mxu1 %v1424_v52 }
  0xa0   :  { %1427 = vmatpush3.bf16.msra.mxu0 %v1426_v55  ;;  %1443 = vmatpush3.bf16.msra.mxu1 %v1426_v55 }
 0x155   :  { %v918_v56 = vpop.f32.mrb[0].mxu0  ;;  %v1024_v57 = vpop.f32.mrb[0].mxu1 }
 0x156   :  { %v1043_v58 = vmul.f32 %v918_v56, %v918_v56  ;;  %v1045_v59 = vmul.f32 %v1024_v57, %v1024_v57  ;;  %v920_v60 = vpop.f32.mrb[1].mxu0  ;;  %v1026_v61 = vpop.f32.mrb[1].mxu1 }
 0x157   :  { %v1044_v62 = vmul.f32 %v920_v60, %v920_v60  ;;  %v1046_v63 = vmul.f32 %v1026_v61, %v1026_v61  ;;  %v922_v0 = vpop.f32.mrb[2].mxu0  ;;  %v1028_v1 = vpop.f32.mrb[2].mxu1 }
 0x158   :  { %v1059_v2 = vadd.f32 %v1045_v59, %v1043_v58  ;;  %v1047_v3 = vmul.f32 %v922_v0, %v922_v0  ;;  %v1049_v4 = vmul.f32 %v1028_v1, %v1028_v1  ;;  %v924_v5 = vpop.f32.mrb[3].mxu0  ;;  %v1030_v6 = vpop.f32.mrb[3].mxu1 }
 0x159   :  { %v1060_v7 = vadd.f32 %v1046_v63, %v1044_v62  ;;  %v1048_v8 = vmul.f32 %v924_v5, %v924_v5  ;;  %v1050_v9 = vmul.f32 %v1030_v6, %v1030_v6 }
 0x15a   :  { %v1061_v10 = vadd.f32 %v1049_v4, %v1047_v3 }
 0x15b   :  { %v1062_v11 = vadd.f32 %v1050_v9, %v1048_v8  ;;  %1163 = vmatprep.mubr.f32.mxu0 %v1060_v7 }
 0x15c   :  { %1164 = vmatmul.mubr.f32.vlgmr.msra.gmra.mrb[8].mxu0 %v1059_v2 }
 0x15d   :  { %v928_v12 = vpop.f32.mrb[4].mxu0  ;;  %v1034_v13 = vpop.f32.mrb[4].mxu1  ;;  %1168 = vmatprep.mubr.f32.mxu0 %v1062_v11 }
 0x15e   :  { %v1051_v14 = vmul.f32 %v928_v12, %v928_v12  ;;  %v1053_v15 = vmul.f32 %v1034_v13, %v1034_v13  ;;  %v930_v16 = vpop.f32.mrb[5].mxu0  ;;  %v1036_v17 = vpop.f32.mrb[5].mxu1 }
 0x15f   :  { %v1052_v18 = vmul.f32 %v930_v16, %v930_v16  ;;  %v1054_v19 = vmul.f32 %v1036_v17, %v1036_v17  ;;  %v932_v20 = vpop.f32.mrb[6].mxu0  ;;  %v1038_v21 = vpop.f32.mrb[6].mxu1 }
 0x160   :  { %v1063_v22 = vadd.f32 %v1053_v15, %v1051_v14  ;;  %v1055_v23 = vmul.f32 %v932_v20, %v932_v20  ;;  %v1057_v24 = vmul.f32 %v1038_v21, %v1038_v21  ;;  %v934_v25 = vpop.f32.mrb[7].mxu0  ;;  %v1040_v26 = vpop.f32.mrb[7].mxu1  ;;  %1169 = vmatmul.mubr.f32.gmra.mrb[10].mxu0 %v1061_v10 }
 0x161   :  { %v1064_v27 = vadd.f32 %v1054_v19, %v1052_v18  ;;  %v1056_v28 = vmul.f32 %v934_v25, %v934_v25  ;;  %v1058_v29 = vmul.f32 %v1040_v26, %v1040_v26 }
 0x162   :  { %v1065_v30 = vadd.f32 %v1057_v24, %v1055_v23 }
 0x163   :  { %v1066_v31 = vadd.f32 %v1058_v29, %v1056_v28  ;;  %1173 = vmatprep.mubr.f32.mxu1 %v1064_v27 }
 0x164   :  { %1174 = vmatmul.mubr.f32.vlgmr.msra.gmra.mrb[8].mxu1 %v1063_v22 }
 0x165   :  { %1178 = vmatprep.mubr.f32.mxu1 %v1066_v31 }
 0x168   :  { %1179 = vmatmul.mubr.f32.gmra.mrb[10].mxu1 %v1065_v30 }
 0x22f   :  { %v1384_v32 = vpop.f32.mrb[8].mxu0 }
 0x230   :  { %v1385_v33 = vpop.f32.mrb[9].mxu0 }
 0x231   :  { %v1386_v34 = vadd.f32 %v1385_v33, %v1384_v32 }
 0x233   :  { %v1184_v35 = vmax.f32 %v1386_v34, 1e-09  ;;  %v1387_v36 = vpop.f32.mrb[10].mxu0 }
 0x234   :  { %v1388_v37 = vpop.f32.mrb[11].mxu0 }
 0x235   :  { %1667 = vlog2.f32 %v1184_v35  ;;  %v1389_v38 = vadd.f32 %v1388_v37, %v1387_v36 }
 0x237   :  { %v1185_v39 = vmax.f32 %v1389_v38, 1e-09  ;;  %v1390_v40 = vpop.f32.mrb[8].mxu1 }
 0x238   :  { %v1391_v41 = vpop.f32.mrb[9].mxu1 }
 0x239   :  { %1669 = vlog2.f32 %v1185_v39  ;;  %v1392_v42 = vadd.f32 %v1391_v41, %v1390_v40 }
 0x23b   :  { %v1186_v43 = vmax.f32 %v1392_v42, 1e-09  ;;  %v1393_v44 = vpop.f32.mrb[10].mxu1 }
 0x23c   :  { %v1394_v45 = vpop.f32.mrb[11].mxu1 }
 0x23d   :  { %1671 = vlog2.f32 %v1186_v43  ;;  %v1395_v46 = vadd.f32 %v1394_v45, %v1393_v44 }
 0x23f   :  { %v1668_v47 = vpop.eup %1667  ;;  %v1187_v48 = vmax.f32 %v1395_v46, 1e-09 }
 0x240   :  { %v1189_v49 = vmul.f32 0.6931472, %v1668_v47 }
 0x241   :  { %1673 = vlog2.f32 %v1187_v48 }
 0x242   :  { %1196 = vst [vmem:[#allocation2] sm:$0xff] %v1189_v49 }
 0x243   :  { %v1670_v50 = vpop.eup %1669 }
 0x244   :  { %v1191_v51 = vmul.f32 0.6931472, %v1670_v50 }
 0x246   :  { %1197 = vst [vmem:[#allocation2 + $0x8] sm:$0xff] %v1191_v51 }
 0x247   :  { %v1672_v52 = vpop.eup %1671 }
 0x248   :  { %v1193_v53 = vmul.f32 0.6931472, %v1672_v52 }
 0x24a   :  { %1198 = vst [vmem:[#allocation2 + $0x10] sm:$0xff] %v1193_v53 }
 0x24b   :  { %v1674_v54 = vpop.eup %1673 }
 0x24c   :  { %v1195_v55 = vmul.f32 0.6931472, %v1674_v54 }
 0x24e   :  { %1199 = vst [vmem:[#allocation2 + $0x18] sm:$0xff] %v1195_v55 }
 0x24f   :  { %1686 = shalt.err (!%p1683_p4)
}
 0x250   :  { %s1687_s23 = scalar_lea.hbm %s2241_s3, 512 }
 0x251   :  { %p1688_p5 = scmp.ne.s32.totalorder %s2241_s3, %s1687_s23  ;;  %p1691_p6 = scmp.lt.u32.totalorder %s1687_s23, %s2241_s3 }
 0x253   :  { %p1693_p7 = pnand %p1691_p6, %p1688_p5 }
 0x255   :  { %1696 = shalt.err (!%p1693_p7)
}
 0x256   :  { %s1700_s28 = smov 128   ;;  %s1701_s29 = smov 8  }
 0x257   :  { %1211 = dma.vmem_to_hbm [thread:$0]  %s1206_s1, 512, %s2241_s3, [#allocation3], %s1700_s28, %s1700_s28, %s1701_s29  }
 0x258   :  { %1697 = dma.done.wait [#allocation3], 512  }
 0x259   :  { %1698 = vsyncadd [#allocation3], 4294966784 }
 0x25a   :  { %1215 = vsyncpa [#allocation3], 1 }

</bundles_post_ra>
